<compile_context>
chip_gen: v5e
topology: v5e:2x2
jax: 0.10.0
libtpu: 0.0.40
codegen_flags: <defaults>
</compile_context>

<pallas_src>
import jax
import jax.numpy as jnp
from jax.experimental import pallas as pl
from jax.experimental.pallas import tpu as pltpu


def _mlp_avg_kernel(x_ref, w1_ref, b1_ref, w2_ref, b2_ref, avg_ref, o_ref):
    # Layer 1 + bias + ReLU.  Bias add / ReLU are VPU ops hidden under the MXU pushes.
    h = jnp.dot(x_ref[...], w1_ref[...], preferred_element_type=jnp.float32)
    h = jnp.maximum(h + b1_ref[...], 0.0)
    # Layer 2: (N, 4)
    z = jnp.dot(h, w2_ref[...], preferred_element_type=jnp.float32)
    # Permutation average (rows of avg sum to 1), b2 added once post-average.
    out = jnp.dot(avg_ref[...], z, preferred_element_type=jnp.float32) + b2_ref[...]
    o_ref[...] = out.astype(o_ref.dtype)


def build_avg_matrix(perms, n):
    """avg[i, j] = #{s : perms[s, i] == j} / S, via scatter-add (no (S,N,N) one_hot).

    Build this once per permutation set (hoisted out of the per-call path)."""
    s = perms.shape[0]
    rows = jnp.broadcast_to(jnp.arange(n, dtype=perms.dtype)[None, :], perms.shape)
    return jnp.zeros((n, n), jnp.float32).at[rows, perms].add(jnp.float32(1.0 / s))


def _compiler_params(resident_bytes, dims=None):
    kwargs = {}
    if dims is not None:
        kwargs["dimension_semantics"] = dims
    # Raise scoped VMEM only when we would exceed v5e's conservative 16 MiB default;
    # cap well below v7x's 64 MiB physical VMEM.
    if resident_bytes > (12 << 20):
        kwargs["vmem_limit_bytes"] = min(2 * resident_bytes + (4 << 20), 56 << 20)
    return pltpu.CompilerParams(**kwargs) if kwargs else None


def sampled_symmetrization_net(x, w1, b1, w2, b2, avg, *, row_block=512):
    """x: (N, d_in); w1: (d_in, 32); b1: (1, 32); w2: (32, 4); b2: (1, 4);
    avg: (N, N) precomputed permutation-averaging matrix (see build_avg_matrix)."""
    n, d_in = x.shape
    d_out = w2.shape[1]
    itemsize = 4  # all operands fp32

    small_bytes = itemsize * (x.size + w1.size + b1.size + w2.size + b2.size
                              + avg.size + n * d_out)

    if n <= row_block or n % row_block != 0:
        # Single invocation, every operand a full-array VMEM block: no pipeline
        # prologue/epilogue or double-buffering overhead at small N (1 TC anyway
        # on v5e/v6e).
        vmem = pl.BlockSpec(memory_space=pltpu.MemorySpace.VMEM)
        return pl.pallas_call(
            _mlp_avg_kernel,
            out_shape=jax.ShapeDtypeStruct((n, d_out), jnp.float32),
            in_specs=[vmem] * 6,
            out_specs=vmem,
            compiler_params=_compiler_params(small_bytes),
        )(x, w1, b1, w2, b2, avg)

    # Larger N: 1-D parallel grid over output rows. avg (the only quadratic operand)
    # and out are row-tiled; x and the tiny weights are replicated (index_map -> 0),
    # so they are DMA'd once and kept resident. The MLP over all N rows is recomputed
    # per step, which is negligible next to the avg matmul at these widths.
    tm = row_block
    grid = (n // tm,)
    tiled_bytes = itemsize * (
        x.size + w1.size + b1.size + w2.size + b2.size       # replicated residents
        + 2 * (tm * n) + 2 * (tm * d_out)                     # double-buffered tiles
        + n * 32 + n * d_out                                  # in-kernel h / z temps
    )
    return pl.pallas_call(
        _mlp_avg_kernel,
        out_shape=jax.ShapeDtypeStruct((n, d_out), jnp.float32),
        grid=grid,
        in_specs=[
            pl.BlockSpec((n, d_in), lambda i: (0, 0)),     # x (full, replicated)
            pl.BlockSpec(w1.shape, lambda i: (0, 0)),      # w1
            pl.BlockSpec(b1.shape, lambda i: (0, 0)),      # b1
            pl.BlockSpec(w2.shape, lambda i: (0, 0)),      # w2
            pl.BlockSpec(b2.shape, lambda i: (0, 0)),      # b2
            pl.BlockSpec((tm, n), lambda i: (i, 0)),       # avg (row-tiled)
        ],
        out_specs=pl.BlockSpec((tm, d_out), lambda i: (i, 0)),
        compiler_params=_compiler_params(tiled_bytes, dims=("parallel",)),
    )(x, w1, b1, w2, b2, avg)


def init_params(key, d_in=10, d_hidden=32, d_out=4):
    """Deterministic init mimicking nn.Linear (uniform +/- 1/sqrt(fan_in))."""
    k1, k2, k3, k4 = jax.random.split(key, 4)
    bnd1 = 1.0 / jnp.sqrt(jnp.float32(d_in))
    bnd2 = 1.0 / jnp.sqrt(jnp.float32(d_hidden))
    # weights stored pre-transposed as (fan_in, fan_out)
    w1 = jax.random.uniform(k1, (d_in, d_hidden), jnp.float32, -bnd1, bnd1)
    b1 = jax.random.uniform(k2, (1, d_hidden), jnp.float32, -bnd1, bnd1)
    w2 = jax.random.uniform(k3, (d_hidden, d_out), jnp.float32, -bnd2, bnd2)
    b2 = jax.random.uniform(k4, (1, d_out), jnp.float32, -bnd2, bnd2)
    return w1, b1, w2, b2


if __name__ == "__main__":
    d_in, d_hidden, d_out = 10, 32, 4

    key = jax.random.PRNGKey(0)
    kx, kp, ks, kx2, ks2 = jax.random.split(key, 5)
    w1, b1, w2, b2 = init_params(kp, d_in, d_hidden, d_out)

    def mlp_ref(v):
        return jnp.maximum(v @ w1 + b1, 0.0) @ w2 + b2

    def run_case(k_x, k_samp, n, num_samples, row_block):
        x = jax.random.normal(k_x, (n, d_in), jnp.float32)
        # TODO(synk): create_permutations_sampled has no in-kernel equivalent
        # (host-side random permutation sampling); emulated deterministically here.
        perm_keys = jax.random.split(k_samp, num_samples)
        perms = jnp.stack(
            [jax.random.permutation(k, n) for k in perm_keys]
        ).astype(jnp.int32)                                            # (S, N)

        avg = build_avg_matrix(perms, n)      # hoisted: built once per perms set
        out = sampled_symmetrization_net(x, w1, b1, w2, b2, avg, row_block=row_block)
        out = jax.block_until_ready(out)

        # Pure-JAX reference mirroring the PyTorch loop exactly.
        ref = jnp.zeros((n, d_out), jnp.float32)
        for s_i in range(num_samples):
            ref = ref + mlp_ref(x[perms[s_i], :])
        ref = ref / num_samples

        assert out.shape == (n, d_out)
        err = float(jnp.max(jnp.abs(out - ref)))
        assert jnp.allclose(out, ref, atol=2e-5, rtol=1e-4), err

    # Module's nominal sizes: single no-grid invocation.
    run_case(kx, ks, n=8, num_samples=20, row_block=512)
    # Larger case exercising the 1-D parallel row grid (both TCs on v7x).
    run_case(kx2, ks2, n=256, num_samples=20, row_block=128)

    print("KERNEL_OK")
</pallas_src>

<mosaic_0001>
module attributes {stable_mosaic.version = 11 : i64} {
  func.func @_mlp_avg_kernel(%arg0: memref<8x10xf32, #tpu.memory_space<vmem>>, %arg1: memref<10x32xf32, #tpu.memory_space<vmem>>, %arg2: memref<1x32xf32, #tpu.memory_space<vmem>>, %arg3: memref<32x4xf32, #tpu.memory_space<vmem>>, %arg4: memref<1x4xf32, #tpu.memory_space<vmem>>, %arg5: memref<8x8xf32, #tpu.memory_space<vmem>>, %arg6: memref<8x4xf32, #tpu.memory_space<vmem>>) attributes {dimension_semantics = [], scalar_prefetch = 0 : i64, scratch_operands = 0 : i64, tpu.core_type = #tpu.core_type<tc>} {
    %c0 = arith.constant 0 : index
    %c0_0 = arith.constant 0 : index
    %0 = vector.load %arg0[%c0, %c0_0] : memref<8x10xf32, #tpu.memory_space<vmem>>, vector<8x10xf32>
    %c0_1 = arith.constant 0 : index
    %c0_2 = arith.constant 0 : index
    %1 = vector.load %arg1[%c0_1, %c0_2] : memref<10x32xf32, #tpu.memory_space<vmem>>, vector<10x32xf32>
    %cst = arith.constant dense<0.000000e+00> : vector<8x32xf32>
    %2 = tpu.matmul %0, %1, %cst {dimension_numbers = #tpu.dot_dimension_numbers<[1], [0], [0], [1], [0, 0, 1, 1], [], []>} : vector<8x10xf32>, vector<10x32xf32>, vector<8x32xf32> -> vector<8x32xf32>
    %c0_3 = arith.constant 0 : index
    %c0_4 = arith.constant 0 : index
    %3 = vector.load %arg2[%c0_3, %c0_4] : memref<1x32xf32, #tpu.memory_space<vmem>>, vector<1x32xf32>
    %4 = vector.broadcast %3 : vector<1x32xf32> to vector<8x32xf32>
    %5 = arith.addf %2, %4 : vector<8x32xf32>
    %cst_5 = arith.constant 0.000000e+00 : f32
    %6 = vector.broadcast %cst_5 : f32 to vector<8x32xf32>
    %7 = arith.maximumf %5, %6 : vector<8x32xf32>
    %c0_6 = arith.constant 0 : index
    %c0_7 = arith.constant 0 : index
    %8 = vector.load %arg3[%c0_6, %c0_7] : memref<32x4xf32, #tpu.memory_space<vmem>>, vector<32x4xf32>
    %cst_8 = arith.constant dense<0.000000e+00> : vector<8x4xf32>
    %9 = tpu.matmul %7, %8, %cst_8 {dimension_numbers = #tpu.dot_dimension_numbers<[1], [0], [0], [1], [0, 0, 1, 1], [], []>} : vector<8x32xf32>, vector<32x4xf32>, vector<8x4xf32> -> vector<8x4xf32>
    %c0_9 = arith.constant 0 : index
    %c0_10 = arith.constant 0 : index
    %10 = vector.load %arg5[%c0_9, %c0_10] : memref<8x8xf32, #tpu.memory_space<vmem>>, vector<8x8xf32>
    %cst_11 = arith.constant dense<0.000000e+00> : vector<8x4xf32>
    %11 = tpu.matmul %10, %9, %cst_11 {dimension_numbers = #tpu.dot_dimension_numbers<[1], [0], [0], [1], [0, 0, 1, 1], [], []>} : vector<8x8xf32>, vector<8x4xf32>, vector<8x4xf32> -> vector<8x4xf32>
    %c0_12 = arith.constant 0 : index
    %c0_13 = arith.constant 0 : index
    %12 = vector.load %arg4[%c0_12, %c0_13] : memref<1x4xf32, #tpu.memory_space<vmem>>, vector<1x4xf32>
    %13 = vector.broadcast %12 : vector<1x4xf32> to vector<8x4xf32>
    %14 = arith.addf %11, %13 : vector<8x4xf32>
    %c0_14 = arith.constant 0 : index
    %c0_15 = arith.constant 0 : index
    %15 = vector.load %arg6[%c0_14, %c0_15] : memref<8x4xf32, #tpu.memory_space<vmem>>, vector<8x4xf32>
    tpu.vector_store %arg6[%c0_14, %c0_15], %14 {strides = array<i32>} : memref<8x4xf32, #tpu.memory_space<vmem>>, vector<8x4xf32>,
    return
  }
}

</mosaic_0001>

<bundles_post_ra>
// kernel: tpu_custom_call.1
= control target key start
LH: loop header
LB: loop body
LE: loop exit
PB: predicated region body
PF: predicated region fallthrough
CT: control target
= control target key end

     0   :  { %vm34_vm0 = vcmask 1041408   ;;  %vm30_vm1 = vcmask 80896   ;;  %vm63_vm2 = vcmask 261120   ;;  %vm92_vm3 = vcmask 64512   ;;  %s196_s1 = inlined_call_operand.vmem [shape: f32[10,32], index: 1, kind: input, shape index: {}]   ;;  %s197_s0 = inlined_call_operand.vmem [shape: f32[8,10], index: 0, kind: input, shape index: {}]   ;;  %s198_s3 = inlined_call_operand.vmem [shape: f32[32,4], index: 3, kind: input, shape index: {}]   ;;  %s199_s2 = inlined_call_operand.vmem [shape: f32[1,32], index: 2, kind: input, shape index: {}]   ;;  %s200_s4 = inlined_call_operand.vmem [shape: f32[1,4], index: 4, kind: input, shape index: {}]   ;;  %s201_s5 = inlined_call_operand.vmem [shape: f32[8,8], index: 5, kind: input, shape index: {}]   ;;  %s202_s6 = inlined_call_operand.vmem [shape: f32[8,4], index: 6, kind: output, shape index: {}]  }
   0x1   :  { %v25_v0 = vld [vmem:[%s196_s1 + $0x8] sm:$0x3]  ;;  %v24_v1 = vld [vmem:[%s196_s1] sm:$0xff]  ;;  %v62_v3 = vld [vmem:[%s198_s3 + $0x18] sm:$0xff]  ;;  %vm116_vm4 = vcmask 31744  }
   0x2   :  { %122 = vmatpush.msk.msra.mxu0 %vm34_vm0, %v25_v0  ;;  %v23_v2 = vld [vmem:[%s197_s0] sm:$0xff]  ;;  %79 = vmatpush.msra.mxu1 %v62_v3  ;;  %v61_v4 = vld [vmem:[%s198_s3 + $0x10] sm:$0xff]  ;;  %v60_v5 = vld [vmem:[%s198_s3 + $0x8] sm:$0xff] }
   0x3   :  { %v59_v6 = vld [vmem:[%s198_s3] sm:$0xff] }
   0x4   :  { %53 = vmatpush.msra.mxu0 %v24_v1  ;;  %80 = vmatpush.msra.mxu1 %v61_v4  ;;  %v126_v7 = vld [vmem:[%s199_s2] ss:$0 sm:$0xff] }
   0x5   :  { %123 = vmatmul.msk.f32.vlgmr.msra.gmra.mxu0 %vm30_vm1, %v23_v2  ;;  %v87_v11 = vld [vmem:[%s201_s5] sm:$0xff] }
   0x6   :  { %81 = vmatpush.msra.mxu1 %v60_v5  ;;  %v127_v13 = vld [vmem:[%s200_s4] ss:$0 sm:$0xff] }
   0x8   :  { %82 = vmatpush.msra.mxu1 %v59_v6 }
  0x82   :  { %v55_v8 = vpop.f32.mrf.mxu0 }
  0x83   :  { %v56_v9 = vadd.f32 %v126_v7, %v55_v8 }
  0x85   :  { %v58_v10 = vmax.f32 %v56_v9, 0.0 }
  0x87   :  { %124 = vmatmul.msk.f32.vlgmr.msra.gmra.mxu1 %vm63_vm2, %v58_v10 }
 0x104   :  { %v84_v12 = vpop.f32.mrf.mxu1 }
 0x105   :  { %111 = vmatpush.msra.mxu2 %v84_v12 }
 0x106   :  { %125 = vmatmul.msk.f32.vlgmr.msra.gmra.mxu2 %vm92_vm3, %v87_v11 }
 0x189   :  { %v113_v14 = vpop.f32.mrf.mxu2 }
 0x18a   :  { %v114_v15 = vadd.f32 %v127_v13, %v113_v14 }
 0x18c   :  { %117 = vst.msk [vmem:[%s202_s6] sm:$0xff] %vm116_vm4, %v114_v15 }

</bundles_post_ra>
